<compile_context>
chip_gen: v6e
topology: v6e:2x2x1
jax: 0.10.0
libtpu: 0.0.40
codegen_flags: <defaults>
</compile_context>

<pallas_src>
import functools

import numpy as np
import jax
import jax.numpy as jnp
from jax.experimental import pallas as pl
from jax.experimental.pallas import tpu as pltpu


def _tap_masks_np(H, W):
    """(9, H*W) float32 0/1 masks for 'same' zero padding.

    Tap t = dh*3 + dw of output pixel n = h*W + w reads input pixel
    (h+dh-1, w+dw-1); mask[t, n] == 1.0 iff that source pixel lies inside the
    image.  Computed host-side once (becomes an XLA constant).  With the
    roll-based tap construction these masks also neutralise every lane
    wrap-around (row / image / array edges), so all 8 non-centre masks are
    required (not just the dw ones).
    """
    hh, ww = np.meshgrid(np.arange(H), np.arange(W), indexing="ij")
    rows = []
    for dh in range(3):
        for dw in range(3):
            ok = np.ones((H, W), np.float32)
            if dh == 0:
                ok *= (hh >= 1)
            elif dh == 2:
                ok *= (hh <= H - 2)
            if dw == 0:
                ok *= (ww >= 1)
            elif dw == 2:
                ok *= (ww <= W - 2)
            rows.append(ok.reshape(-1))
    return np.stack(rows, axis=0).astype(np.float32)      # (9, H*W)


def _incompressible_kernel(x_ref, mask_ref, w1_ref, b1_ref, w2_ref, b2_ref,
                           w3_ref, b3_ref, z_ref, ld_ref,
                           *, bb, W, HW, ch):
    N = bb * HW

    # Hoisted loads: weights / biases / masks stay resident across the grid.
    masks = mask_ref[...]                        # (9, N)       f32
    w1 = w1_ref[...]                             # (nh,   9*ch) f32
    w2 = w2_ref[...]                             # (nh,   9*nh) f32
    w3 = w3_ref[...]                             # (2*ch, 9*nh) f32
    b1 = b1_ref[...]                             # (nh,   1)    f32
    b2 = b2_ref[...]                             # (nh,   1)    f32
    b3 = b3_ref[...]                             # (2*ch, 1)    f32
    mask_rows = [None if t == 4 else masks[t:t + 1, :] for t in range(9)]

    x = x_ref[...]                               # (bb, 2, ch, HW) f32
    x0 = x[:, 0]                                 # (bb, ch, HW)
    x1 = x[:, 1]                                 # (bb, ch, HW)

    def to_lanes(v):
        """(bb, c, HW) -> (c, bb*HW): images side-by-side on the lane axis."""
        if bb == 1:
            return v[0]
        # HW is a multiple of 128 at these shapes, so these are aligned
        # lane-tile concatenations (no sublane transpose needed).
        return jnp.concatenate([v[b] for b in range(bb)], axis=1)

    a0 = to_lanes(x0)                            # (ch, N)
    x1_l = to_lanes(x1)                          # (ch, N)

    def conv3x3(a, w, b):
        """3x3 'same' conv over all bb images at once.

        a: (Ci, N) f32, w: (Co, 9*Ci) f32 -> (Co, N) f32.  The 9 shifted taps
        (pltpu.roll on the lane axis, masked by the boundary masks) are
        stacked along K so the whole layer is a single MXU matmul.
        """
        taps = []
        for t in range(9):
            dh, dw = divmod(t, 3)
            s = (dh - 1) * W + (dw - 1)          # tap reads input pixel n + s
            if s == 0:
                taps.append(a)                   # centre tap: no shift / mask
            else:
                # jnp.roll convention: out[n] = a[(n - shift) mod N].
                tap = pltpu.roll(a, (-s) % N, 1)
                taps.append(tap * mask_rows[t])
        patch = jnp.concatenate(taps, axis=0)    # (9*Ci, N)
        out = jnp.dot(w, patch, preferred_element_type=jnp.float32)
        return out + b                           # one bias add per layer/step

    h1 = jnp.maximum(conv3x3(a0, w1, b1), 0.0)   # (nh,   N)
    h2 = jnp.maximum(conv3x3(h1, w2, b2), 0.0)   # (nh,   N)
    st = jnp.tanh(conv3x3(h2, w3, b3))           # (2*ch, N)

    s_half = st[:ch, :]
    t_half = st[ch:, :]
    s_half = s_half - jnp.mean(s_half, axis=0, keepdims=True)   # centre over C
    z1 = jnp.exp(s_half) * x1_l + t_half         # (ch, N)

    for b in range(bb):                          # cheap coupling epilogue only
        sl = slice(b * HW, (b + 1) * HW)         # lane-aligned static slice
        z_ref[b, 0, :, :] = z1[:, sl]            # lane-dense (ch, HW) store
        # Per-image log-det reduced to a scalar immediately (frees vregs).
        ld_ref[b, :, :] = jnp.sum(s_half[:, sl], axis=(0, 1), keepdims=True)


def incompressible_cnn_forward(x_nchw, params):
    """Pallas implementation of IncompressibleCNN.forward.

    x: (B, C, H, W) -> (z (B, C, H, W), log_det (B,)).
    """
    B, C, H, W = x_nchw.shape
    assert C % 2 == 0
    ch = C // 2
    HW = H * W
    nh = params["w1"].shape[-1]

    # Images folded per grid step.  Keep >= 2 grid steps whenever B >= 2 so
    # the "parallel" batch axis can feed both v7x TensorCores and so the DMA
    # pipeline has steps to overlap; prefer more steps over bigger blocks on
    # v5e as well (lower HBM BW, smaller scoped-VMEM default).
    bb = 1
    for cand in (8, 4, 2, 1):
        if cand <= max(1, B // 2) and B % cand == 0:
            bb = cand
            break
    N = bb * HW

    # NCHW -> (B, 2, ch, H*W): pure reshape (no HBM transpose).  The channel
    # halves get their own axis so the z-output BlockSpec can address ONLY
    # the z1 half while keeping the last two block dims full-extent.
    x_split = x_nchw.reshape(B, 2, ch, HW).astype(jnp.float32)

    # Conv weights flattened for im2col: (Co, 9*Ci), K ordered (dh, dw, ci).
    # Kept f32 (matmuls are overhead-bound, not MXU-bound, at these sizes).
    def flat_w(w):
        co = w.shape[-1]
        return jnp.transpose(w, (3, 0, 1, 2)).reshape(co, -1).astype(jnp.float32)

    w1m = flat_w(params["w1"])
    w2m = flat_w(params["w2"])
    w3m = flat_w(params["w3"])
    b1 = params["b1"].reshape(-1, 1).astype(jnp.float32)           # (nh, 1)
    b2 = params["b2"].reshape(-1, 1).astype(jnp.float32)
    b3 = params["b3"].reshape(-1, 1).astype(jnp.float32)
    # Boundary masks tiled across the bb images sharing the lane axis.
    masks = jnp.asarray(np.tile(_tap_masks_np(H, W), (1, bb)))     # (9, N)

    kernel = functools.partial(_incompressible_kernel,
                               bb=bb, W=W, HW=HW, ch=ch)

    # TODO(synk): for large H*W add a spatial grid axis with a 1-row halo and
    # an explicit vmem_limit_bytes so blocks fit v7x's 64 MiB VMEM.
    z_split, ld = pl.pallas_call(
        kernel,
        out_shape=[
            jax.ShapeDtypeStruct((B, 2, ch, HW), jnp.float32),
            jax.ShapeDtypeStruct((B, 1, 1), jnp.float32),
        ],
        grid_spec=pltpu.PrefetchScalarGridSpec(
            num_scalar_prefetch=0,
            grid=(B // bb,),
            in_specs=[
                pl.BlockSpec((bb, 2, ch, HW), lambda g: (g, 0, 0, 0)),  # x
                pl.BlockSpec((9, N), lambda g: (0, 0)),                 # masks
                pl.BlockSpec((nh, 9 * ch), lambda g: (0, 0)),           # w1
                pl.BlockSpec((nh, 1), lambda g: (0, 0)),                # b1
                pl.BlockSpec((nh, 9 * nh), lambda g: (0, 0)),           # w2
                pl.BlockSpec((nh, 1), lambda g: (0, 0)),                # b2
                pl.BlockSpec((C, 9 * nh), lambda g: (0, 0)),            # w3
                pl.BlockSpec((C, 1), lambda g: (0, 0)),                 # b3
            ],
            out_specs=[
                # Only the z1 half is ever written back; the x0 half of the
                # aliased buffer passes through untouched (-25% HBM traffic).
                pl.BlockSpec((bb, 1, ch, HW), lambda g: (g, 1, 0, 0)),
                pl.BlockSpec((bb, 1, 1), lambda g: (g, 0, 0)),
            ],
        ),
        compiler_params=pltpu.CompilerParams(
            dimension_semantics=("parallel",)),
        # z reuses x's HBM buffer: output blocks never visited by out_specs[0]
        # (the x0 half) retain the aliased input values.
        input_output_aliases={0: 0},
    )(x_split, masks, w1m, b1, w2m, b2, w3m, b3)

    return z_split.reshape(B, C, H, W), ld.reshape(B)


def reference_forward(x_nchw, params):
    """Pure-JAX (XLA) reference matching the PyTorch module semantics."""
    x = jnp.transpose(x_nchw, (0, 2, 3, 1)).astype(jnp.float32)   # NHWC
    C = x.shape[-1]
    Ch = C // 2
    x0, x1 = x[..., :Ch], x[..., Ch:]

    def conv(a, w, b):
        y = jax.lax.conv_general_dilated(
            a, w, window_strides=(1, 1), padding="SAME",
            dimension_numbers=("NHWC", "HWIO", "NHWC"),
            precision=jax.lax.Precision.HIGHEST)
        return y + b

    h = jax.nn.relu(conv(x0, params["w1"], params["b1"]))
    h = jax.nn.relu(conv(h, params["w2"], params["b2"]))
    st = jnp.tanh(conv(h, params["w3"], params["b3"]))
    s, t = st[..., :Ch], st[..., Ch:]
    s = s - jnp.mean(s, axis=-1, keepdims=True)
    z1 = jnp.exp(s) * x1 + t
    z = jnp.concatenate([x0, z1], axis=-1)
    log_det = jnp.sum(s, axis=(1, 2, 3))
    return jnp.transpose(z, (0, 3, 1, 2)), log_det


def init_params(key, in_channels, nh):
    """Deterministic synthetic weights.  Conv weights stored as HWIO."""
    cin = in_channels // 2
    cout = in_channels
    ks = jax.random.split(key, 6)
    scale = 0.1
    return {
        "w1": scale * jax.random.normal(ks[0], (3, 3, cin, nh), jnp.float32),
        "b1": scale * jax.random.normal(ks[1], (1, 1, nh), jnp.float32),
        "w2": scale * jax.random.normal(ks[2], (3, 3, nh, nh), jnp.float32),
        "b2": scale * jax.random.normal(ks[3], (1, 1, nh), jnp.float32),
        "w3": scale * jax.random.normal(ks[4], (3, 3, nh, cout), jnp.float32),
        "b3": scale * jax.random.normal(ks[5], (1, 1, cout), jnp.float32),
    }


if __name__ == "__main__":
    # x is donated so the z<->x aliasing is honoured without a defensive copy
    # (the x0 half of z is never re-written to HBM).
    fwd = jax.jit(incompressible_cnn_forward, donate_argnums=0)

    test_shapes = [
        (2, 4, 16, 16, 16),   # bb=1, grid=(2,)
        (2, 8, 16, 16, 16),   # bb=1, grid=(2,)
        (4, 4, 16, 16, 16),   # bb=2, grid=(2,)  -> exercises the batched path
    ]
    for (B, C, H, W, nh) in test_shapes:
        key = jax.random.PRNGKey(0)
        kx, kp = jax.random.split(key)
        x = jax.random.normal(kx, (B, C, H, W), jnp.float32)
        params = init_params(kp, C, nh)

        # Reference first: x is donated to the Pallas path below.
        z_ref, ld_ref = reference_forward(x, params)
        z_ref = jax.block_until_ready(z_ref)

        z, log_det = fwd(x, params)
        z = jax.block_until_ready(z)
        log_det = jax.block_until_ready(log_det)

        assert z.shape == (B, C, H, W) and log_det.shape == (B,)
        # Conservative tolerances (kernel matmuls run at default MXU
        # precision); f32 operands keep the error well inside them.
        assert jnp.allclose(z, z_ref, rtol=5e-2, atol=5e-2), "z mismatch"
        assert jnp.allclose(log_det, ld_ref, rtol=0.0, atol=1e-3), "log_det mismatch"

    print("KERNEL_OK")
</pallas_src>

<mosaic_0001>
module attributes {stable_mosaic.version = 11 : i64} {
  func.func @_incompressible_kernel(%arg0: i32, %arg1: memref<1x2x2x256xf32, #tpu.memory_space<vmem>>, %arg2: memref<9x256xf32, #tpu.memory_space<vmem>>, %arg3: memref<16x18xf32, #tpu.memory_space<vmem>>, %arg4: memref<16x1xf32, #tpu.memory_space<vmem>>, %arg5: memref<16x144xf32, #tpu.memory_space<vmem>>, %arg6: memref<16x1xf32, #tpu.memory_space<vmem>>, %arg7: memref<4x144xf32, #tpu.memory_space<vmem>>, %arg8: memref<4x1xf32, #tpu.memory_space<vmem>>, %arg9: memref<1x1x2x256xf32, #tpu.memory_space<vmem>>, %arg10: memref<1x1x1xf32, #tpu.memory_space<vmem>>) attributes {dimension_semantics = [#tpu.dimension_semantics<parallel>], iteration_bounds = array<i64: 2>, scalar_prefetch = 0 : i64, scratch_operands = 0 : i64, tpu.core_type = #tpu.core_type<tc>, window_params = [{transform_indices = @transform_0, window_bounds = array<i64: 1, 2, 2, 256>}, {pipeline_mode = #tpu.pipeline_mode<synchronous>, transform_indices = @transform_1, window_bounds = array<i64: 9, 256>}, {pipeline_mode = #tpu.pipeline_mode<synchronous>, transform_indices = @transform_2, window_bounds = array<i64: 16, 18>}, {pipeline_mode = #tpu.pipeline_mode<synchronous>, transform_indices = @transform_3, window_bounds = array<i64: 16, 1>}, {pipeline_mode = #tpu.pipeline_mode<synchronous>, transform_indices = @transform_4, window_bounds = array<i64: 16, 144>}, {pipeline_mode = #tpu.pipeline_mode<synchronous>, transform_indices = @transform_5, window_bounds = array<i64: 16, 1>}, {pipeline_mode = #tpu.pipeline_mode<synchronous>, transform_indices = @transform_6, window_bounds = array<i64: 4, 144>}, {pipeline_mode = #tpu.pipeline_mode<synchronous>, transform_indices = @transform_7, window_bounds = array<i64: 4, 1>}, {transform_indices = @transform_8, window_bounds = array<i64: 1, 1, 2, 256>}, {transform_indices = @transform_9, window_bounds = array<i64: 1, 1, 1>}]} {
    %c0 = arith.constant 0 : index
    %c0_0 = arith.constant 0 : index
    %0 = vector.load %arg2[%c0, %c0_0] : memref<9x256xf32, #tpu.memory_space<vmem>>, vector<9x256xf32>
    %c0_1 = arith.constant 0 : index
    %c0_2 = arith.constant 0 : index
    %1 = vector.load %arg3[%c0_1, %c0_2] : memref<16x18xf32, #tpu.memory_space<vmem>>, vector<16x18xf32>
    %c0_3 = arith.constant 0 : index
    %c0_4 = arith.constant 0 : index
    %2 = vector.load %arg5[%c0_3, %c0_4] : memref<16x144xf32, #tpu.memory_space<vmem>>, vector<16x144xf32>
    %c0_5 = arith.constant 0 : index
    %c0_6 = arith.constant 0 : index
    %3 = vector.load %arg7[%c0_5, %c0_6] : memref<4x144xf32, #tpu.memory_space<vmem>>, vector<4x144xf32>
    %c0_7 = arith.constant 0 : index
    %c0_8 = arith.constant 0 : index
    %4 = vector.load %arg4[%c0_7, %c0_8] : memref<16x1xf32, #tpu.memory_space<vmem>>, vector<16x1xf32>
    %c0_9 = arith.constant 0 : index
    %c0_10 = arith.constant 0 : index
    %5 = vector.load %arg6[%c0_9, %c0_10] : memref<16x1xf32, #tpu.memory_space<vmem>>, vector<16x1xf32>
    %c0_11 = arith.constant 0 : index
    %c0_12 = arith.constant 0 : index
    %6 = vector.load %arg8[%c0_11, %c0_12] : memref<4x1xf32, #tpu.memory_space<vmem>>, vector<4x1xf32>
    %7 = vector.extract_strided_slice %0 {offsets = [0, 0], sizes = [1, 256], strides = [1, 1]} : vector<9x256xf32> to vector<1x256xf32>
    %8 = vector.extract_strided_slice %0 {offsets = [1, 0], sizes = [1, 256], strides = [1, 1]} : vector<9x256xf32> to vector<1x256xf32>
    %9 = vector.extract_strided_slice %0 {offsets = [2, 0], sizes = [1, 256], strides = [1, 1]} : vector<9x256xf32> to vector<1x256xf32>
    %10 = vector.extract_strided_slice %0 {offsets = [3, 0], sizes = [1, 256], strides = [1, 1]} : vector<9x256xf32> to vector<1x256xf32>
    %11 = vector.extract_strided_slice %0 {offsets = [5, 0], sizes = [1, 256], strides = [1, 1]} : vector<9x256xf32> to vector<1x256xf32>
    %12 = vector.extract_strided_slice %0 {offsets = [6, 0], sizes = [1, 256], strides = [1, 1]} : vector<9x256xf32> to vector<1x256xf32>
    %13 = vector.extract_strided_slice %0 {offsets = [7, 0], sizes = [1, 256], strides = [1, 1]} : vector<9x256xf32> to vector<1x256xf32>
    %14 = vector.extract_strided_slice %0 {offsets = [8, 0], sizes = [1, 256], strides = [1, 1]} : vector<9x256xf32> to vector<1x256xf32>
    %c0_13 = arith.constant 0 : index
    %c0_14 = arith.constant 0 : index
    %c0_15 = arith.constant 0 : index
    %c0_16 = arith.constant 0 : index
    %15 = vector.load %arg1[%c0_13, %c0_14, %c0_15, %c0_16] : memref<1x2x2x256xf32, #tpu.memory_space<vmem>>, vector<1x2x2x256xf32>
    %16 = vector.extract_strided_slice %15 {offsets = [0, 0, 0, 0], sizes = [1, 1, 2, 256], strides = [1, 1, 1, 1]} : vector<1x2x2x256xf32> to vector<1x1x2x256xf32>
    %17 = vector.shape_cast %16 : vector<1x1x2x256xf32> to vector<1x2x256xf32>
    %18 = vector.extract_strided_slice %15 {offsets = [0, 1, 0, 0], sizes = [1, 1, 2, 256], strides = [1, 1, 1, 1]} : vector<1x2x2x256xf32> to vector<1x1x2x256xf32>
    %19 = vector.shape_cast %18 : vector<1x1x2x256xf32> to vector<1x2x256xf32>
    %20 = vector.shape_cast %17 : vector<1x2x256xf32> to vector<2x256xf32>
    %21 = vector.shape_cast %19 : vector<1x2x256xf32> to vector<2x256xf32>
    %c17_i32 = arith.constant 17 : i32
    %22 = tpu.dynamic_rotate %20 by %c17_i32 dim 1 : vector<2x256xf32>, i32 -> vector<2x256xf32>
    %23 = vector.broadcast %7 : vector<1x256xf32> to vector<2x256xf32>
    %24 = arith.mulf %22, %23 : vector<2x256xf32>
    %c16_i32 = arith.constant 16 : i32
    %25 = tpu.dynamic_rotate %20 by %c16_i32 dim 1 : vector<2x256xf32>, i32 -> vector<2x256xf32>
    %26 = vector.broadcast %8 : vector<1x256xf32> to vector<2x256xf32>
    %27 = arith.mulf %25, %26 : vector<2x256xf32>
    %c15_i32 = arith.constant 15 : i32
    %28 = tpu.dynamic_rotate %20 by %c15_i32 dim 1 : vector<2x256xf32>, i32 -> vector<2x256xf32>
    %29 = vector.broadcast %9 : vector<1x256xf32> to vector<2x256xf32>
    %30 = arith.mulf %28, %29 : vector<2x256xf32>
    %c1_i32 = arith.constant 1 : i32
    %31 = tpu.dynamic_rotate %20 by %c1_i32 dim 1 : vector<2x256xf32>, i32 -> vector<2x256xf32>
    %32 = vector.broadcast %10 : vector<1x256xf32> to vector<2x256xf32>
    %33 = arith.mulf %31, %32 : vector<2x256xf32>
    %c255_i32 = arith.constant 255 : i32
    %34 = tpu.dynamic_rotate %20 by %c255_i32 dim 1 : vector<2x256xf32>, i32 -> vector<2x256xf32>
    %35 = vector.broadcast %11 : vector<1x256xf32> to vector<2x256xf32>
    %36 = arith.mulf %34, %35 : vector<2x256xf32>
    %c241_i32 = arith.constant 241 : i32
    %37 = tpu.dynamic_rotate %20 by %c241_i32 dim 1 : vector<2x256xf32>, i32 -> vector<2x256xf32>
    %38 = vector.broadcast %12 : vector<1x256xf32> to vector<2x256xf32>
    %39 = arith.mulf %37, %38 : vector<2x256xf32>
    %c240_i32 = arith.constant 240 : i32
    %40 = tpu.dynamic_rotate %20 by %c240_i32 dim 1 : vector<2x256xf32>, i32 -> vector<2x256xf32>
    %41 = vector.broadcast %13 : vector<1x256xf32> to vector<2x256xf32>
    %42 = arith.mulf %40, %41 : vector<2x256xf32>
    %c239_i32 = arith.constant 239 : i32
    %43 = tpu.dynamic_rotate %20 by %c239_i32 dim 1 : vector<2x256xf32>, i32 -> vector<2x256xf32>
    %44 = vector.broadcast %14 : vector<1x256xf32> to vector<2x256xf32>
    %45 = arith.mulf %43, %44 : vector<2x256xf32>
    %46 = tpu.concatenate %24, %27, %30, %33, %20, %36, %39, %42, %45 in 0 : vector<2x256xf32>, vector<2x256xf32>, vector<2x256xf32>, vector<2x256xf32>, vector<2x256xf32>, vector<2x256xf32>, vector<2x256xf32>, vector<2x256xf32>, vector<2x256xf32> -> vector<18x256xf32>
    %cst = arith.constant dense<0.000000e+00> : vector<16x256xf32>
    %47 = tpu.matmul %1, %46, %cst {dimension_numbers = #tpu.dot_dimension_numbers<[1], [0], [0], [1], [0, 0, 1, 1], [], []>} : vector<16x18xf32>, vector<18x256xf32>, vector<16x256xf32> -> vector<16x256xf32>
    %48 = vector.broadcast %4 : vector<16x1xf32> to vector<16x256xf32>
    %49 = arith.addf %47, %48 : vector<16x256xf32>
    %cst_17 = arith.constant 0.000000e+00 : f32
    %50 = vector.broadcast %cst_17 : f32 to vector<16x256xf32>
    %51 = arith.maximumf %49, %50 : vector<16x256xf32>
    %c17_i32_18 = arith.constant 17 : i32
    %52 = tpu.dynamic_rotate %51 by %c17_i32_18 dim 1 : vector<16x256xf32>, i32 -> vector<16x256xf32>
    %53 = vector.broadcast %7 : vector<1x256xf32> to vector<16x256xf32>
    %54 = arith.mulf %52, %53 : vector<16x256xf32>
    %c16_i32_19 = arith.constant 16 : i32
    %55 = tpu.dynamic_rotate %51 by %c16_i32_19 dim 1 : vector<16x256xf32>, i32 -> vector<16x256xf32>
    %56 = vector.broadcast %8 : vector<1x256xf32> to vector<16x256xf32>
    %57 = arith.mulf %55, %56 : vector<16x256xf32>
    %c15_i32_20 = arith.constant 15 : i32
    %58 = tpu.dynamic_rotate %51 by %c15_i32_20 dim 1 : vector<16x256xf32>, i32 -> vector<16x256xf32>
    %59 = vector.broadcast %9 : vector<1x256xf32> to vector<16x256xf32>
    %60 = arith.mulf %58, %59 : vector<16x256xf32>
    %c1_i32_21 = arith.constant 1 : i32
    %61 = tpu.dynamic_rotate %51 by %c1_i32_21 dim 1 : vector<16x256xf32>, i32 -> vector<16x256xf32>
    %62 = vector.broadcast %10 : vector<1x256xf32> to vector<16x256xf32>
    %63 = arith.mulf %61, %62 : vector<16x256xf32>
    %c255_i32_22 = arith.constant 255 : i32
    %64 = tpu.dynamic_rotate %51 by %c255_i32_22 dim 1 : vector<16x256xf32>, i32 -> vector<16x256xf32>
    %65 = vector.broadcast %11 : vector<1x256xf32> to vector<16x256xf32>
    %66 = arith.mulf %64, %65 : vector<16x256xf32>
    %c241_i32_23 = arith.constant 241 : i32
    %67 = tpu.dynamic_rotate %51 by %c241_i32_23 dim 1 : vector<16x256xf32>, i32 -> vector<16x256xf32>
    %68 = vector.broadcast %12 : vector<1x256xf32> to vector<16x256xf32>
    %69 = arith.mulf %67, %68 : vector<16x256xf32>
    %c240_i32_24 = arith.constant 240 : i32
    %70 = tpu.dynamic_rotate %51 by %c240_i32_24 dim 1 : vector<16x256xf32>, i32 -> vector<16x256xf32>
    %71 = vector.broadcast %13 : vector<1x256xf32> to vector<16x256xf32>
    %72 = arith.mulf %70, %71 : vector<16x256xf32>
    %c239_i32_25 = arith.constant 239 : i32
    %73 = tpu.dynamic_rotate %51 by %c239_i32_25 dim 1 : vector<16x256xf32>, i32 -> vector<16x256xf32>
    %74 = vector.broadcast %14 : vector<1x256xf32> to vector<16x256xf32>
    %75 = arith.mulf %73, %74 : vector<16x256xf32>
    %76 = tpu.concatenate %54, %57, %60, %63, %51, %66, %69, %72, %75 in 0 : vector<16x256xf32>, vector<16x256xf32>, vector<16x256xf32>, vector<16x256xf32>, vector<16x256xf32>, vector<16x256xf32>, vector<16x256xf32>, vector<16x256xf32>, vector<16x256xf32> -> vector<144x256xf32>
    %cst_26 = arith.constant dense<0.000000e+00> : vector<16x256xf32>
    %77 = tpu.matmul %2, %76, %cst_26 {dimension_numbers = #tpu.dot_dimension_numbers<[1], [0], [0], [1], [0, 0, 1, 1], [], []>} : vector<16x144xf32>, vector<144x256xf32>, vector<16x256xf32> -> vector<16x256xf32>
    %78 = vector.broadcast %5 : vector<16x1xf32> to vector<16x256xf32>
    %79 = arith.addf %77, %78 : vector<16x256xf32>
    %cst_27 = arith.constant 0.000000e+00 : f32
    %80 = vector.broadcast %cst_27 : f32 to vector<16x256xf32>
    %81 = arith.maximumf %79, %80 : vector<16x256xf32>
    %c17_i32_28 = arith.constant 17 : i32
    %82 = tpu.dynamic_rotate %81 by %c17_i32_28 dim 1 : vector<16x256xf32>, i32 -> vector<16x256xf32>
    %83 = vector.broadcast %7 : vector<1x256xf32> to vector<16x256xf32>
    %84 = arith.mulf %82, %83 : vector<16x256xf32>
    %c16_i32_29 = arith.constant 16 : i32
    %85 = tpu.dynamic_rotate %81 by %c16_i32_29 dim 1 : vector<16x256xf32>, i32 -> vector<16x256xf32>
    %86 = vector.broadcast %8 : vector<1x256xf32> to vector<16x256xf32>
    %87 = arith.mulf %85, %86 : vector<16x256xf32>
    %c15_i32_30 = arith.constant 15 : i32
    %88 = tpu.dynamic_rotate %81 by %c15_i32_30 dim 1 : vector<16x256xf32>, i32 -> vector<16x256xf32>
    %89 = vector.broadcast %9 : vector<1x256xf32> to vector<16x256xf32>
    %90 = arith.mulf %88, %89 : vector<16x256xf32>
    %c1_i32_31 = arith.constant 1 : i32
    %91 = tpu.dynamic_rotate %81 by %c1_i32_31 dim 1 : vector<16x256xf32>, i32 -> vector<16x256xf32>
    %92 = vector.broadcast %10 : vector<1x256xf32> to vector<16x256xf32>
    %93 = arith.mulf %91, %92 : vector<16x256xf32>
    %c255_i32_32 = arith.constant 255 : i32
    %94 = tpu.dynamic_rotate %81 by %c255_i32_32 dim 1 : vector<16x256xf32>, i32 -> vector<16x256xf32>
    %95 = vector.broadcast %11 : vector<1x256xf32> to vector<16x256xf32>
    %96 = arith.mulf %94, %95 : vector<16x256xf32>
    %c241_i32_33 = arith.constant 241 : i32
    %97 = tpu.dynamic_rotate %81 by %c241_i32_33 dim 1 : vector<16x256xf32>, i32 -> vector<16x256xf32>
    %98 = vector.broadcast %12 : vector<1x256xf32> to vector<16x256xf32>
    %99 = arith.mulf %97, %98 : vector<16x256xf32>
    %c240_i32_34 = arith.constant 240 : i32
    %100 = tpu.dynamic_rotate %81 by %c240_i32_34 dim 1 : vector<16x256xf32>, i32 -> vector<16x256xf32>
    %101 = vector.broadcast %13 : vector<1x256xf32> to vector<16x256xf32>
    %102 = arith.mulf %100, %101 : vector<16x256xf32>
    %c239_i32_35 = arith.constant 239 : i32
    %103 = tpu.dynamic_rotate %81 by %c239_i32_35 dim 1 : vector<16x256xf32>, i32 -> vector<16x256xf32>
    %104 = vector.broadcast %14 : vector<1x256xf32> to vector<16x256xf32>
    %105 = arith.mulf %103, %104 : vector<16x256xf32>
    %106 = tpu.concatenate %84, %87, %90, %93, %81, %96, %99, %102, %105 in 0 : vector<16x256xf32>, vector<16x256xf32>, vector<16x256xf32>, vector<16x256xf32>, vector<16x256xf32>, vector<16x256xf32>, vector<16x256xf32>, vector<16x256xf32>, vector<16x256xf32> -> vector<144x256xf32>
    %cst_36 = arith.constant dense<0.000000e+00> : vector<4x256xf32>
    %107 = tpu.matmul %3, %106, %cst_36 {dimension_numbers = #tpu.dot_dimension_numbers<[1], [0], [0], [1], [0, 0, 1, 1], [], []>} : vector<4x144xf32>, vector<144x256xf32>, vector<4x256xf32> -> vector<4x256xf32>
    %108 = vector.broadcast %6 : vector<4x1xf32> to vector<4x256xf32>
    %109 = arith.addf %107, %108 : vector<4x256xf32>
    %110 = math.tanh %109 : vector<4x256xf32>
    %111 = vector.extract_strided_slice %110 {offsets = [0, 0], sizes = [2, 256], strides = [1, 1]} : vector<4x256xf32> to vector<2x256xf32>
    %112 = vector.extract_strided_slice %110 {offsets = [2, 0], sizes = [2, 256], strides = [1, 1]} : vector<4x256xf32> to vector<2x256xf32>
    %cst_37 = arith.constant dense<0.000000e+00> : vector<256xf32>
    %113 = vector.multi_reduction <add>, %111, %cst_37 [0] : vector<2x256xf32> to vector<256xf32>
    %114 = vector.shape_cast %113 : vector<256xf32> to vector<1x256xf32>
    %cst_38 = arith.constant 2.000000e+00 : f32
    %115 = vector.broadcast %cst_38 : f32 to vector<1x256xf32>
    %116 = arith.divf %114, %115 : vector<1x256xf32>
    %117 = vector.broadcast %116 : vector<1x256xf32> to vector<2x256xf32>
    %118 = arith.subf %111, %117 : vector<2x256xf32>
    %119 = math.exp %118 : vector<2x256xf32>
    %120 = arith.mulf %119, %21 : vector<2x256xf32>
    %121 = arith.addf %120, %112 : vector<2x256xf32>
    %c0_39 = arith.constant 0 : index
    %c0_40 = arith.constant 0 : index
    %c0_41 = arith.constant 0 : index
    %c0_42 = arith.constant 0 : index
    %122 = vector.load %arg9[%c0_39, %c0_40, %c0_41, %c0_42] : memref<1x1x2x256xf32, #tpu.memory_space<vmem>>, vector<1x1x2x256xf32>
    %123 = vector.shape_cast %122 : vector<1x1x2x256xf32> to vector<2x256xf32>
    %124 = vector.shape_cast %121 : vector<2x256xf32> to vector<1x1x2x256xf32>
    tpu.vector_store %arg9[%c0_39, %c0_40, %c0_41, %c0_42], %124 {strides = array<i32>} : memref<1x1x2x256xf32, #tpu.memory_space<vmem>>, vector<1x1x2x256xf32>,
    %125 = vector.shape_cast %118 : vector<2x256xf32> to vector<1x2x256xf32>
    %cst_43 = arith.constant dense<0.000000e+00> : vector<1xf32>
    %126 = vector.multi_reduction <add>, %125, %cst_43 [1, 2] : vector<1x2x256xf32> to vector<1xf32>
    %127 = vector.shape_cast %126 : vector<1xf32> to vector<1x1x1xf32>
    %128 = vector.extract %127[0, 0, 0] : f32 from vector<1x1x1xf32>
    %129 = vector.broadcast %128 : f32 to vector<1x1xf32>
    %c0_44 = arith.constant 0 : index
    %c0_45 = arith.constant 0 : index
    %c0_46 = arith.constant 0 : index
    %130 = vector.load %arg10[%c0_44, %c0_45, %c0_46] : memref<1x1x1xf32, #tpu.memory_space<vmem>>, vector<1x1x1xf32>
    %131 = vector.shape_cast %130 : vector<1x1x1xf32> to vector<1x1xf32>
    %132 = vector.shape_cast %129 : vector<1x1xf32> to vector<1x1x1xf32>
    tpu.vector_store %arg10[%c0_44, %c0_45, %c0_46], %132 {strides = array<i32>} : memref<1x1x1xf32, #tpu.memory_space<vmem>>, vector<1x1x1xf32>,
    return
  }
  func.func @transform_0(%arg0: i32) -> (i32, i32, i32, i32) {
    %c0_i32 = arith.constant 0 : i32
    %c0_i32_0 = arith.constant 0 : i32
    %c0_i32_1 = arith.constant 0 : i32
    %c0_i32_2 = arith.constant 0 : i32
    return %arg0, %c0_i32, %c0_i32_0, %c0_i32_1 : i32, i32, i32, i32
  }
  func.func @transform_1(%arg0: i32) -> (i32, i32) {
    %c0_i32 = arith.constant 0 : i32
    %c0_i32_0 = arith.constant 0 : i32
    %c0_i32_1 = arith.constant 0 : i32
    return %c0_i32, %c0_i32_0 : i32, i32
  }
  func.func @transform_2(%arg0: i32) -> (i32, i32) {
    %c0_i32 = arith.constant 0 : i32
    %c0_i32_0 = arith.constant 0 : i32
    %c0_i32_1 = arith.constant 0 : i32
    return %c0_i32, %c0_i32_0 : i32, i32
  }
  func.func @transform_3(%arg0: i32) -> (i32, i32) {
    %c0_i32 = arith.constant 0 : i32
    %c0_i32_0 = arith.constant 0 : i32
    %c0_i32_1 = arith.constant 0 : i32
    return %c0_i32, %c0_i32_0 : i32, i32
  }
  func.func @transform_4(%arg0: i32) -> (i32, i32) {
    %c0_i32 = arith.constant 0 : i32
    %c0_i32_0 = arith.constant 0 : i32
    %c0_i32_1 = arith.constant 0 : i32
    return %c0_i32, %c0_i32_0 : i32, i32
  }
  func.func @transform_5(%arg0: i32) -> (i32, i32) {
    %c0_i32 = arith.constant 0 : i32
    %c0_i32_0 = arith.constant 0 : i32
    %c0_i32_1 = arith.constant 0 : i32
    return %c0_i32, %c0_i32_0 : i32, i32
  }
  func.func @transform_6(%arg0: i32) -> (i32, i32) {
    %c0_i32 = arith.constant 0 : i32
    %c0_i32_0 = arith.constant 0 : i32
    %c0_i32_1 = arith.constant 0 : i32
    return %c0_i32, %c0_i32_0 : i32, i32
  }
  func.func @transform_7(%arg0: i32) -> (i32, i32) {
    %c0_i32 = arith.constant 0 : i32
    %c0_i32_0 = arith.constant 0 : i32
    %c0_i32_1 = arith.constant 0 : i32
    return %c0_i32, %c0_i32_0 : i32, i32
  }
  func.func @transform_8(%arg0: i32) -> (i32, i32, i32, i32) {
    %c1_i32 = arith.constant 1 : i32
    %c0_i32 = arith.constant 0 : i32
    %c0_i32_0 = arith.constant 0 : i32
    %c0_i32_1 = arith.constant 0 : i32
    return %arg0, %c1_i32, %c0_i32, %c0_i32_0 : i32, i32, i32, i32
  }
  func.func @transform_9(%arg0: i32) -> (i32, i32, i32) {
    %c0_i32 = arith.constant 0 : i32
    %c0_i32_0 = arith.constant 0 : i32
    %c0_i32_1 = arith.constant 0 : i32
    return %arg0, %c0_i32, %c0_i32_0 : i32, i32, i32
  }
}

</mosaic_0001>

<bundles_post_ra>
// kernel: incompressible_cnn_forward.1
= control target key start
LH: loop header
LB: loop body
LE: loop exit
PB: predicated region body
PF: predicated region fallthrough
CT: control target
= control target key end

     0   :  { %s1388_s30 = smov 0   ;;  %s2029_s0 = inlined_call_operand.vmem [shape: f32[2,2,2,256], index: 0, kind: input, shape index: {}, may-alias: {0,8}]   ;;  %s2030_s1 = inlined_call_operand.vmem [shape: f32[9,256], index: 1, kind: input, shape index: {}]   ;;  %s2031_s2 = inlined_call_operand.vmem [shape: f32[16,18], index: 2, kind: input, shape index: {}]   ;;  %s2032_s3 = inlined_call_operand.vmem [shape: f32[16,1], index: 3, kind: input, shape index: {}]   ;;  %s2033_s4 = inlined_call_operand.vmem [shape: f32[16,144], index: 4, kind: input, shape index: {}]   ;;  %s2034_s5 = inlined_call_operand.vmem [shape: f32[16,1], index: 5, kind: input, shape index: {}]   ;;  %s2035_s6 = inlined_call_operand.vmem [shape: f32[4,144], index: 6, kind: input, shape index: {}]   ;;  %s2036_s7 = inlined_call_operand.vmem [shape: f32[4,1], index: 7, kind: input, shape index: {}]   ;;  %s2037_s8 = inlined_call_operand.vmem [shape: f32[2,2,2,256], index: 8, kind: output, shape index: {0}, may-alias: {0,8}]   ;;  %s2038_s9 = inlined_call_operand.vmem [shape: f32[2,1,1], index: 9, kind: output, shape index: {1}]  }
   0x1 LB: > { %s1263_s10 = sadd.s32 4294967295, %s1326_s30   ;;  %p1267_p0 = scmp.ge.s32.totalorder %s1326_s30, 1  ;;  %s1326_s30 = sphi %s1388_s30, %s20_s30  }
   0x2   : > { %p290_p1 = scmp.lt.s32.totalorder %s1326_s30, 3 }
   0x4   : > { %p291_p2 = pnand %p1267_p0, %p290_p1 }
   0x5   : > { %p330_p3 = scmp.lt.s32.totalorder (!%p291_p2), %s1263_s10, 1  ;;  %s1328_s15 = smov (!%p291_p2), 113  }
   0x6   : > { %294 = sbr.rel (%p291_p2) target bundleno = 1357 (0x54d), region = 52  ;;  %s1329_s16 = smov (!%p291_p2), 127  }
   0x7   : > { %s1330_s17 = smov (!%p291_p2), 16   ;;  %s1331_s18 = smov (!%p291_p2), 112  }
   0x8   : > { %s1332_s19 = smov (!%p291_p2), 15   ;;  %s1333_s20 = smov (!%p291_p2), 111  }
   0x9   : > { %s1335_s21 = smov (!%p291_p2), 17   ;;  %s1336_s22 = smov (!%p291_p2), 1  }
   0xb   : > { %s2040_s10 = smov (!%p330_p3, %s1263_s10), 1  ;;  %v1334_v2 = vmov 0.0   ;;  %v1337_v3 = vmov 0   ;;  %v355_v4 = vld [vmem:[%s2032_s3] sm:$0xff]  ;;  %v356_v5 = vld [vmem:[%s2032_s3 + $0x8] sm:$0xff]  ;;  %v377_v6 = vlaneseq  ;;  %vm547_vm4 = vcmask 1041408  }
   0xc   : > { %s1286_s11 = sshll.u32 %s2040_s10, 3  ;;  %649 = vmatprep.mubr.f32.mxu0 %v1334_v2  ;;  %1310 = vset.pattern.permute.xlu1 %v1337_v3  ;;  %v1461_v14 = vld [vmem:[%s2030_s1 + $0x8] sm:$0xff]  ;;  %v1467_v18 = vld [vmem:[%s2030_s1] sm:$0xff]  ;;  %vm550_vm6 = vcmask 1043456   ;;  %vm553_vm8 = vcmask 1045504   ;;  %vm572_vm11 = vcmask 146432   ;;  %s343_s24 = scalar_lea.vmem %s2038_s9, %s2040_s10 }
   0xd   : > { %s1404_s14 = scalar_lea.vmem %s2029_s0, %s1286_s11  ;;  %1309 = vset.pattern.permute.xlu0 %v1337_v3  ;;  %v1452_v9 = vshrl.u32 %v377_v6, 7  ;;  %v1454_v12 = vand.u32 127, %v377_v6  ;;  %v1529_v51 = vld [vmem:[%s2030_s1 + $0x10] ss:$0 sm:$0xff]  ;;  %v1534_v52 = vld [vmem:[%s2030_s1 + $0x18] ss:$0 sm:$0xff] }
   0xe   : > { %v1407_v0 = vld.sshfl [vmem:[%s1404_s14] sm:$0x33 pattern:$0x76325410]  ;;  %vm804_vm12 = vcmask 130048   ;;  %vm1171_vm13 = vcmask 0  }
   0xf   : > { %460 = vrot.lane.b32.xlu1 %v1407_v0, %s1328_s15  ;;  %443 = vrot.lane.b32.xlu0 %v1407_v0, %s1329_s16  ;;  %v1415_v1 = vcombine.high %v1407_v0, %v1407_v0  ;;  %v452_v13 = vsub.s32 5, %v1452_v9  ;;  %vm447_vm0 = vcmp.lt.s32.totalorder %v1454_v12, 127  ;;  %v469_v15 = vsub.s32 6, %v1452_v9 }
  0x10   : > { %v486_v20 = vsub.s32 7, %v1452_v9  ;;  %vm464_vm1 = vcmp.lt.s32.totalorder %v1454_v12, 113  ;;  %v401_v21 = vsub.s32 1, %v1452_v9  ;;  %vm481_vm2 = vcmp.lt.s32.totalorder %v1454_v12, 112 }
  0x11   : > { %v1470_v19 = vrot.slane %v1461_v14, %v452_v13  ;;  %v1476_v22 = vrot.slane %v1467_v18, %v452_v13  ;;  %v1484_v25 = vrot.slane %v1467_v18, %v469_v15  ;;  %v1487_v26 = vrot.slane %v1461_v14, %v469_v15 }
  0x12   : > { %vm396_vm3 = vcmp.lt.s32.totalorder %v1454_v12, 16  ;;  %v1494_v31 = vrot.slane %v1461_v14, %v486_v20  ;;  %v418_v32 = vsub.s32 2, %v1452_v9  ;;  %v1498_v33 = vrot.slane %v1467_v18, %v401_v21 }
  0x13   : > { %392 = vrot.lane.b32.xlu0 %v1407_v0, %s1330_s17  ;;  %462 = vrot.lane.b32.xlu1 %v1415_v1, %s1328_s15  ;;  %v1502_v35 = vrot.slane %v1467_v18, %v486_v20  ;;  %v1507_v37 = vrot.slane %v1461_v14, %v401_v21  ;;  %v384_v39 = vsub.s32 0, %v1452_v9  ;;  %vm413_vm5 = vcmp.lt.s32.totalorder %v1454_v12, 15 }
  0x14   : > { %v1518_v46 = vrot.slane %v1467_v18, %v418_v32  ;;  %v1521_v47 = vrot.slane %v1461_v14, %v418_v32  ;;  %vm498_vm7 = vcmp.lt.s32.totalorder %v1454_v12, 111  ;;  %vm379_vm9 = vcmp.lt.s32.totalorder %v1454_v12, 17 }
  0x15   : > { %v1538_v53 = vrot.slane %v1467_v18, %v384_v39  ;;  %v435_v54 = vsub.s32 3, %v1452_v9  ;;  %v1546_v60 = vrot.slane %v1461_v14, %v384_v39  ;;  %vm430_vm10 = vcmp.lt.s32.totalorder %v1454_v12, 1 }
  0x17   : > { %394 = vrot.lane.b32.xlu1 %v1415_v1, %s1330_s17  ;;  %445 = vrot.lane.b32.xlu0 %v1415_v1, %s1329_s16 }
  0x1b   : > { %479 = vrot.lane.b32.xlu1 %v1415_v1, %s1331_s18  ;;  %477 = vrot.lane.b32.xlu0 %v1407_v0, %s1331_s18 }
  0x1f   : > { %411 = vrot.lane.b32.xlu1 %v1415_v1, %s1332_s19  ;;  %409 = vrot.lane.b32.xlu0 %v1407_v0, %s1332_s19 }
  0x23   : > { %496 = vrot.lane.b32.xlu1 %v1415_v1, %s1333_s20  ;;  %494 = vrot.lane.b32.xlu0 %v1407_v0, %s1333_s20 }
  0x27   : > { %375 = vrot.lane.b32.xlu1 %v1415_v1, %s1335_s21  ;;  %373 = vrot.lane.b32.xlu0 %v1407_v0, %s1335_s21 }
  0x2b   : > { %428 = vrot.lane.b32.xlu1 %v1415_v1, %s1336_s22  ;;  %426 = vrot.lane.b32.xlu0 %v1407_v0, %s1336_s22 }
  0x2f   : > { %564 = vperm.xlu1 %1310, %v355_v4   ;;  %569 = vperm.xlu0 %1309, %v356_v5  }
  0x81   : > { %v461_v7 = vpop.permute.xlu1 %460  ;;  %v444_v8 = vpop.permute.xlu0 %443 }
  0x85   : > { %v393_v10 = vpop.permute.xlu0 %392  ;;  %v463_v11 = vpop.permute.xlu1 %462 }
  0x86   : > { %v466_v29 = vsel %vm464_vm1, %v463_v11, %v461_v7  ;;  %v465_v40 = vsel %vm464_vm1, %v461_v7, %v463_v11 }
  0x87   : > { %v476_v41 = vmul.f32 %v1487_v26, %v466_v29  ;;  %v475_v50 = vmul.f32 %v1484_v25, %v465_v40 }
  0x89   : > { %v395_v16 = vpop.permute.xlu1 %394  ;;  %v446_v17 = vpop.permute.xlu0 %445  ;;  %v538_v55 = vrot.slane %v476_v41, 4 }
  0x8a   : > { %v449_v23 = vsel %vm447_vm0, %v446_v17, %v444_v8  ;;  %v448_v24 = vsel %vm447_vm0, %v444_v8, %v446_v17  ;;  %v397_v56 = vsel %vm396_vm3, %v393_v10, %v395_v16  ;;  %v398_v57 = vsel %vm396_vm3, %v395_v16, %v393_v10 }
  0x8b   : > { %v459_v30 = vmul.f32 %v1470_v19, %v449_v23  ;;  %v458_v34 = vmul.f32 %v1476_v22, %v448_v24  ;;  %v537_v8 = vrot.slane %v475_v50, 4  ;;  %v407_v9 = vmul.f32 %v1498_v33, %v398_v57  ;;  %v348_v57 = vld [vmem:[%s2031_s2] sm:$0xff] }
  0x8c   : > { %v1561_v10 = vrot.slane %v1467_v18, %v435_v54  ;;  %v408_v11 = vmul.f32 %v1507_v37, %v397_v56 }
  0x8d   : > { %v480_v27 = vpop.permute.xlu1 %479  ;;  %v478_v28 = vpop.permute.xlu0 %477  ;;  %v532_v44 = vrot.slane %v459_v30, 6  ;;  %v531_v48 = vrot.slane %v458_v34, 6  ;;  %v513_v32 = vrot.slane %v407_v9, 6 }
  0x8e   : > { %v483_v36 = vsel %vm481_vm2, %v480_v27, %v478_v28  ;;  %v482_v38 = vsel %vm481_vm2, %v478_v28, %v480_v27  ;;  %v1581_v28 = vrot.slane %v1461_v14, %v435_v54  ;;  %v514_v34 = vrot.slane %v408_v11, 6 }
  0x8f   : > { %v493_v45 = vmul.f32 %v1494_v31, %v483_v36  ;;  %v492_v49 = vmul.f32 %v1502_v35, %v482_v38  ;;  %v557_v3 = vsel %vm547_vm4, %v1415_v1, %v532_v44  ;;  %v556_v7 = vsel %vm547_vm4, %v1407_v0, %v531_v48 }
  0x90   : > { %v559_v16 = vsel %vm550_vm6, %v557_v3, %v538_v55  ;;  %v558_v21 = vsel %vm550_vm6, %v556_v7, %v537_v8 }
  0x91   : > { %v412_v42 = vpop.permute.xlu1 %411  ;;  %v410_v43 = vpop.permute.xlu0 %409  ;;  %v544_v61 = vrot.slane %v493_v45, 2  ;;  %v543_v4 = vrot.slane %v492_v49, 2 }
  0x92   : > { %v414_v1 = vsel %vm413_vm5, %v410_v43, %v412_v42  ;;  %v415_v13 = vsel %vm413_vm5, %v412_v42, %v410_v43 }
  0x93   : > { %v561_v20 = vsel %vm553_vm8, %v559_v16, %v544_v61  ;;  %v560_v27 = vsel %vm553_vm8, %v558_v21, %v543_v4  ;;  %v424_v29 = vmul.f32 %v1518_v46, %v415_v13  ;;  %v425_v30 = vmul.f32 %v1521_v47, %v414_v1  ;;  %v351_v13 = vld [vmem:[%s2033_s4 + $0x8] sm:$0xff] }
  0x94   : > { %1279 = vmatprep.mubr.msk.f32.mxu1 %vm804_vm12, %v351_v13 }
  0x95   : > { %v497_v58 = vpop.permute.xlu1 %496  ;;  %v495_v59 = vpop.permute.xlu0 %494  ;;  %v519_v44 = vrot.slane %v424_v29, 4  ;;  %v520_v45 = vrot.slane %v425_v30, 4 }
  0x96   : > { %v499_v62 = vsel %vm498_vm7, %v495_v59, %v497_v58  ;;  %v500_v63 = vsel %vm498_vm7, %v497_v58, %v495_v59  ;;  %v349_v58 = vld [vmem:[%s2031_s2 + $0x8] sm:$0xff] }
  0x97   : > { %v509_v5 = vmul.f32 %v1529_v51, %v499_v62  ;;  %v510_v6 = vmul.f32 %v1534_v52, %v500_v63 }
  0x99   : > { %v376_v15 = vpop.permute.xlu1 %375  ;;  %1275 = vmatprep.subr.msk.mxu0 %vm547_vm4, %v510_v6  ;;  %v374_v0 = vpop.permute.xlu0 %373 }
  0x9a   : > { %v380_v17 = vsel %vm379_vm9, %v374_v0, %v376_v15  ;;  %v381_v18 = vsel %vm379_vm9, %v376_v15, %v374_v0  ;;  %1276 = vmatpush1.msk.msra.mxu0 %vm547_vm4, %v509_v5  ;;  %v358_v15 = vld [vmem:[%s2034_s5 + $0x8] sm:$0xff]  ;;  %v357_v0 = vld [vmem:[%s2034_s5] sm:$0xff] }
  0x9b   : > { %v390_v23 = vmul.f32 %v1538_v53, %v381_v18  ;;  %v391_v24 = vmul.f32 %v1546_v60, %v380_v17  ;;  %613 = vmatprep.subr.mxu0 %v561_v20 }
  0x9c   : > { %614 = vmatpush1.msra.mxu0 %v560_v27 }
  0x9d   : > { %v429_v36 = vpop.permute.xlu1 %428  ;;  %v427_v38 = vpop.permute.xlu0 %426  ;;  %v549_v42 = vsel %vm547_vm4, %v391_v24, %v514_v34  ;;  %v548_v43 = vsel %vm547_vm4, %v390_v23, %v513_v32 }
  0x9e   : > { %v431_v39 = vsel %vm430_vm10, %v427_v38, %v429_v36  ;;  %v432_v40 = vsel %vm430_vm10, %v429_v36, %v427_v38  ;;  %v552_v50 = vsel %vm550_vm6, %v549_v42, %v520_v45  ;;  %v551_v54 = vsel %vm550_vm6, %v548_v43, %v519_v44 }
  0x9f   : > { %v441_v41 = vmul.f32 %v1561_v10, %v432_v40  ;;  %v442_v14 = vmul.f32 %v1581_v28, %v431_v39 }
  0xa1   : > { %v525_v48 = vrot.slane %v441_v41, 2  ;;  %v526_v49 = vrot.slane %v442_v14, 2 }
  0xa3   : > { %v555_v55 = vsel %vm553_vm8, %v552_v50, %v526_v49  ;;  %v554_v56 = vsel %vm553_vm8, %v551_v54, %v525_v48 }
  0xa4   : > { %615 = vmatprep.subr.mxu0 %v555_v55 }
  0xa5   : > { %616 = vmatpush1.msra.mxu0 %v554_v56 }
  0xa6   : > { %1277 = vmatmul.mubr.msk.f32.vlgmr.msra.gmra.mxu0 %vm572_vm11, %v348_v57 }
  0xa7   : > { %655 = vmatprep.mubr.f32.mxu0 %v1334_v2 }
  0xaa   : > { %1278 = vmatmul.mubr.msk.f32.gmra.mxu0 %vm572_vm11, %v349_v58  ;;  %v565_v59 = vpop.permute.xlu1 %564  ;;  %v570_v6 = vpop.permute.xlu0 %569 }
 0x166   : > { %v651_v61 = vpop.f32.mrf.mxu0 }
 0x167   : > { %v652_v62 = vadd.f32 %v651_v61, %v565_v59 }
 0x168   : > { %v653_v63 = vpop.f32.mrf.mxu0 }
 0x169   : > { %v1604_v3 = vmax.f32 %v652_v62, 0.0  ;;  %v654_v4 = vadd.f32 %v653_v63, %v565_v59 }
 0x16a   : > { %v657_v2 = vpop.f32.mrf.mxu0 }
 0x16b   : > { %v1606_v5 = vmax.f32 %v654_v4, 0.0  ;;  %762 = vrot.lane.b32.xlu1 %v1604_v3, %s1331_s18  ;;  %v658_v7 = vadd.f32 %v657_v2, %v570_v6 }
 0x16c   : > { %v659_v8 = vpop.f32.mrf.mxu0 }
 0x16d   : > { %766 = vrot.lane.b32.xlu0 %v1606_v5, %s1331_s18  ;;  %v660_v9 = vadd.f32 %v659_v8, %v570_v6  ;;  %v1628_v11 = vmax.f32 %v658_v7, 0.0 }
 0x16f   : > { %746 = vrot.lane.b32.xlu1 %v1604_v3, %s1328_s15  ;;  %v1634_v1 = vmax.f32 %v660_v9, 0.0 }
 0x171   : > { %750 = vrot.lane.b32.xlu0 %v1606_v5, %s1328_s15 }
 0x173   : > { %730 = vrot.lane.b32.xlu1 %v1604_v3, %s1329_s16 }
 0x175   : > { %734 = vrot.lane.b32.xlu0 %v1606_v5, %s1329_s16 }
 0x177   : > { %714 = vrot.lane.b32.xlu1 %v1604_v3, %s1336_s22 }
 0x179   : > { %718 = vrot.lane.b32.xlu0 %v1606_v5, %s1336_s22 }
 0x17b   : > { %698 = vrot.lane.b32.xlu1 %v1604_v3, %s1332_s19 }
 0x17d   : > { %702 = vrot.lane.b32.xlu0 %v1606_v5, %s1332_s19 }
 0x17f   : > { %682 = vrot.lane.b32.xlu1 %v1604_v3, %s1330_s17 }
 0x181   : > { %686 = vrot.lane.b32.xlu0 %v1606_v5, %s1330_s17 }
 0x183   : > { %764 = vrot.lane.b32.xlu1 %v1628_v11, %s1331_s18 }
 0x185   : > { %768 = vrot.lane.b32.xlu0 %v1634_v1, %s1331_s18 }
 0x187   : > { %748 = vrot.lane.b32.xlu1 %v1628_v11, %s1328_s15 }
 0x189   : > { %752 = vrot.lane.b32.xlu0 %v1634_v1, %s1328_s15 }
 0x18b   : > { %732 = vrot.lane.b32.xlu1 %v1628_v11, %s1329_s16 }
 0x18d   : > { %736 = vrot.lane.b32.xlu0 %v1634_v1, %s1329_s16 }
 0x18f   : > { %666 = vrot.lane.b32.xlu1 %v1604_v3, %s1335_s21 }
 0x191   : > { %670 = vrot.lane.b32.xlu0 %v1606_v5, %s1335_s21 }
 0x193   : > { %716 = vrot.lane.b32.xlu1 %v1628_v11, %s1336_s22 }
 0x195   : > { %720 = vrot.lane.b32.xlu0 %v1634_v1, %s1336_s22 }
 0x197   : > { %700 = vrot.lane.b32.xlu1 %v1628_v11, %s1332_s19 }
 0x199   : > { %704 = vrot.lane.b32.xlu0 %v1634_v1, %s1332_s19 }
 0x19b   : > { %684 = vrot.lane.b32.xlu1 %v1628_v11, %s1330_s17 }
 0x19d   : > { %688 = vrot.lane.b32.xlu0 %v1634_v1, %s1330_s17 }
 0x19f   : > { %668 = vrot.lane.b32.xlu1 %v1628_v11, %s1335_s21 }
 0x1a1   : > { %672 = vrot.lane.b32.xlu0 %v1634_v1, %s1335_s21 }
 0x1a3   : > { %780 = vrot.lane.b32.xlu1 %v1628_v11, %s1333_s20 }
 0x1a5   : > { %784 = vrot.lane.b32.xlu0 %v1634_v1, %s1333_s20 }
 0x1a7   : > { %778 = vrot.lane.b32.xlu1 %v1604_v3, %s1333_s20 }
 0x1a9   : > { %782 = vrot.lane.b32.xlu0 %v1606_v5, %s1333_s20 }
 0x1ab   : > { %801 = vperm.xlu1 %1310, %v358_v15  }
 0x1ad   : > { %796 = vperm.xlu0 %1309, %v357_v0  }
 0x1dd   : > { %v763_v16 = vpop.permute.xlu1 %762 }
 0x1df   : > { %v767_v17 = vpop.permute.xlu0 %766 }
 0x1e0   : > { %v772_v39 = vsel %vm481_vm2, %v767_v17, %v763_v16  ;;  %v770_v14 = vsel %vm481_vm2, %v763_v16, %v767_v17 }
 0x1e1   : > { %v747_v18 = vpop.permute.xlu1 %746  ;;  %v775_v45 = vmul.f32 %v772_v39, %v1494_v31  ;;  %v774_v49 = vmul.f32 %v770_v14, %v1502_v35 }
 0x1e3   : > { %v751_v20 = vpop.permute.xlu0 %750 }
 0x1e4   : > { %v756_v50 = vsel %vm464_vm1, %v751_v20, %v747_v18  ;;  %v754_v56 = vsel %vm464_vm1, %v747_v18, %v751_v20 }
 0x1e5   : > { %v731_v21 = vpop.permute.xlu1 %730  ;;  %v759_v61 = vmul.f32 %v756_v50, %v1487_v26  ;;  %v758_v63 = vmul.f32 %v754_v56, %v1484_v25 }
 0x1e7   : > { %v735_v23 = vpop.permute.xlu0 %734 }
 0x1e8   : > { %v740_v4 = vsel %vm447_vm0, %v735_v23, %v731_v21  ;;  %v738_v7 = vsel %vm447_vm0, %v731_v21, %v735_v23 }
 0x1e9   : > { %v715_v24 = vpop.permute.xlu1 %714  ;;  %v743_v15 = vmul.f32 %v740_v4, %v1470_v19  ;;  %v742_v16 = vmul.f32 %v738_v7, %v1476_v22 }
 0x1eb   : > { %v719_v27 = vpop.permute.xlu0 %718 }
 0x1ec   : > { %v722_v20 = vsel %vm430_vm10, %v715_v24, %v719_v27 }
 0x1ed   : > { %v1686_v29 = vpop.permute.xlu1 %698 }
 0x1ef   : > { %v1688_v30 = vpop.permute.xlu0 %702 }
 0x1f1   : > { %v1690_v32 = vpop.permute.xlu1 %682 }
 0x1f3   : > { %v1692_v34 = vpop.permute.xlu0 %686 }
 0x1f4   : > { %v692_v50 = vsel %vm396_vm3, %v1692_v34, %v1690_v32 }
 0x1f5   : > { %v765_v36 = vpop.permute.xlu1 %764 }
 0x1f7   : > { %v769_v38 = vpop.permute.xlu0 %768 }
 0x1f8   : > { %v771_v40 = vsel %vm481_vm2, %v765_v36, %v769_v38  ;;  %v773_v41 = vsel %vm481_vm2, %v769_v38, %v765_v36  ;;  %v724_v36 = vsel %vm430_vm10, %v719_v27, %v715_v24 }
 0x1f9   : > { %v749_v42 = vpop.permute.xlu1 %748  ;;  %v777_v43 = vmul.f32 %v773_v41, %v1494_v31  ;;  %v776_v44 = vmul.f32 %v771_v40, %v1502_v35  ;;  %v727_v40 = vmul.f32 %v722_v20, %v1581_v28  ;;  %v726_v14 = vmul.f32 %v724_v36, %v1561_v10  ;;  %v350_v36 = vld [vmem:[%s2033_s4] sm:$0xff] }
 0x1fb   : > { %811 = vmatprep.subr.mxu1 %v777_v43  ;;  %v753_v48 = vpop.permute.xlu0 %752 }
 0x1fc   : > { %v755_v54 = vsel %vm464_vm1, %v749_v42, %v753_v48  ;;  %v757_v55 = vsel %vm464_vm1, %v753_v48, %v749_v42  ;;  %812 = vmatpush1.msra.mxu1 %v776_v44 }
 0x1fd   : > { %v760_v57 = vmul.f32 %v755_v54, %v1484_v25  ;;  %v761_v58 = vmul.f32 %v757_v55, %v1487_v26  ;;  %v733_v59 = vpop.permute.xlu1 %732  ;;  %813 = vmatprep.subr.mxu1 %v775_v45 }
 0x1fe   : > { %814 = vmatpush1.msra.mxu1 %v774_v49  ;;  %v690_v49 = vsel %vm396_vm3, %v1690_v32, %v1692_v34 }
 0x1ff   : > { %815 = vmatprep.subr.mxu1 %v761_v58  ;;  %v737_v62 = vpop.permute.xlu0 %736 }
 0x200   : > { %v739_v2 = vsel %vm447_vm0, %v733_v59, %v737_v62  ;;  %v741_v6 = vsel %vm447_vm0, %v737_v62, %v733_v59  ;;  %816 = vmatpush1.msra.mxu1 %v760_v57  ;;  %v695_v57 = vmul.f32 %v690_v49, %v1507_v37  ;;  %v694_v59 = vmul.f32 %v692_v50, %v1498_v33  ;;  %v1875_v49 = vld [vmem:[%s2035_s6] sm:$0xff] }
 0x201   : > { %v744_v8 = vmul.f32 %v739_v2, %v1476_v22  ;;  %v745_v9 = vmul.f32 %v741_v6, %v1470_v19  ;;  %v667_v13 = vpop.permute.xlu1 %666  ;;  %817 = vmatprep.subr.mxu1 %v759_v61 }
 0x202   : > { %818 = vmatpush1.msra.mxu1 %v758_v63 }
 0x203   : > { %819 = vmatprep.subr.mxu1 %v745_v9  ;;  %v671_v0 = vpop.permute.xlu0 %670 }
 0x204   : > { %820 = vmatpush1.msra.mxu1 %v744_v8  ;;  %v674_v61 = vsel %vm379_vm9, %v667_v13, %v671_v0  ;;  %v676_v34 = vsel %vm379_vm9, %v671_v0, %v667_v13 }
 0x205   : > { %v717_v17 = vpop.permute.xlu1 %716  ;;  %821 = vmatprep.subr.mxu1 %v743_v15  ;;  %v679_v6 = vmul.f32 %v674_v61, %v1546_v60  ;;  %v678_v8 = vmul.f32 %v676_v34, %v1538_v53 }
 0x206   : > { %822 = vmatpush1.msra.mxu1 %v742_v16 }
 0x207   : > { %823 = vmatprep.subr.mxu1 %v1634_v1  ;;  %v721_v18 = vpop.permute.xlu0 %720 }
 0x208   : > { %v723_v21 = vsel %vm430_vm10, %v717_v17, %v721_v18  ;;  %v725_v23 = vsel %vm430_vm10, %v721_v18, %v717_v17  ;;  %824 = vmatpush1.msra.mxu1 %v1628_v11  ;;  %v706_v11 = vsel %vm413_vm5, %v1686_v29, %v1688_v30 }
 0x209   : > { %v728_v38 = vmul.f32 %v725_v23, %v1561_v10  ;;  %v729_v39 = vmul.f32 %v723_v21, %v1581_v28  ;;  %v701_v1 = vpop.permute.xlu1 %700  ;;  %825 = vmatprep.subr.mxu1 %v1606_v5  ;;  %v711_v44 = vmul.f32 %v706_v11, %v1521_v47 }
 0x20a   : > { %826 = vmatpush1.msra.mxu1 %v1604_v3  ;;  %v708_v3 = vsel %vm413_vm5, %v1688_v30, %v1686_v29 }
 0x20b   : > { %827 = vmatprep.subr.mxu1 %v729_v39  ;;  %v705_v41 = vpop.permute.xlu0 %704  ;;  %v710_v48 = vmul.f32 %v708_v3, %v1518_v46  ;;  %v352_v39 = vld [vmem:[%s2033_s4 + $0x10] sm:$0xff] }
 0x20c   : > { %v707_v24 = vsel %vm413_vm5, %v701_v1, %v705_v41  ;;  %v709_v27 = vsel %vm413_vm5, %v705_v41, %v701_v1  ;;  %828 = vmatpush1.msra.mxu1 %v728_v38  ;;  %v353_v38 = vld [vmem:[%s2033_s4 + $0x18] sm:$0xff] }
 0x20d   : > { %v712_v5 = vmul.f32 %v709_v27, %v1518_v46  ;;  %v713_v42 = vmul.f32 %v707_v24, %v1521_v47  ;;  %v685_v43 = vpop.permute.xlu1 %684  ;;  %829 = vmatprep.subr.mxu1 %v727_v40 }
 0x20e   : > { %830 = vmatpush1.msra.mxu1 %v726_v14 }
 0x20f   : > { %831 = vmatprep.subr.mxu1 %v713_v42  ;;  %v689_v45 = vpop.permute.xlu0 %688 }
 0x210   : > { %v691_v29 = vsel %vm396_vm3, %v685_v43, %v689_v45  ;;  %v693_v30 = vsel %vm396_vm3, %v689_v45, %v685_v43  ;;  %832 = vmatpush1.msra.mxu1 %v712_v5 }
 0x211   : > { %v696_v54 = vmul.f32 %v693_v30, %v1498_v33  ;;  %v697_v55 = vmul.f32 %v691_v29, %v1507_v37  ;;  %v669_v56 = vpop.permute.xlu1 %668  ;;  %833 = vmatprep.subr.mxu1 %v711_v44  ;;  %v1026_v29 = vcombine.high %v1875_v49, %v1875_v49  ;;  %v359_v30 = vld [vmem:[%s2036_s7] sm:$0xf] }
 0x212   : > { %834 = vmatpush1.msra.mxu1 %v710_v48 }
 0x213   : > { %835 = vmatprep.subr.mxu1 %v697_v55  ;;  %v673_v58 = vpop.permute.xlu0 %672  ;;  %1281 = vmatprep.mubr.msk.f32.mxu0 %vm804_vm12, %v1026_v29 }
 0x214   : > { %v675_v62 = vsel %vm379_vm9, %v669_v56, %v673_v58  ;;  %v677_v32 = vsel %vm379_vm9, %v673_v58, %v669_v56  ;;  %836 = vmatpush1.msra.mxu1 %v696_v54 }
 0x215   : > { %v680_v63 = vmul.f32 %v677_v32, %v1538_v53  ;;  %v681_v4 = vmul.f32 %v675_v62, %v1546_v60  ;;  %v781_v2 = vpop.permute.xlu1 %780  ;;  %837 = vmatprep.subr.mxu1 %v695_v57 }
 0x216   : > { %838 = vmatpush1.msra.mxu1 %v694_v59 }
 0x217   : > { %839 = vmatprep.subr.mxu1 %v681_v4  ;;  %v785_v7 = vpop.permute.xlu0 %784 }
 0x218   : > { %v787_v9 = vsel %vm498_vm7, %v781_v2, %v785_v7  ;;  %v789_v15 = vsel %vm498_vm7, %v785_v7, %v781_v2  ;;  %840 = vmatpush1.msra.mxu1 %v680_v63 }
 0x219   : > { %v792_v13 = vmul.f32 %v1529_v51, %v787_v9  ;;  %v793_v0 = vmul.f32 %v1534_v52, %v789_v15  ;;  %841 = vmatprep.subr.mxu1 %v679_v6  ;;  %v779_v16 = vpop.permute.xlu1 %778 }
 0x21a   : > { %842 = vmatpush1.msra.mxu1 %v678_v8 }
 0x21b   : > { %871 = vmatprep.subr.mxu1 %v793_v0  ;;  %v783_v17 = vpop.permute.xlu0 %782 }
 0x21c   : > { %v786_v18 = vsel %vm498_vm7, %v779_v16, %v783_v17  ;;  %v788_v20 = vsel %vm498_vm7, %v783_v17, %v779_v16  ;;  %872 = vmatpush2.msra.mxu1 %v792_v13 }
 0x21d   : > { %v790_v21 = vmul.f32 %v1529_v51, %v786_v18  ;;  %v791_v23 = vmul.f32 %v1534_v52, %v788_v20 }
 0x21f   : > { %873 = vmatprep.subr.mxu1 %v791_v23 }
 0x220   : > { %874 = vmatpush2.msra.mxu1 %v790_v21 }
 0x221   : > { %876 = vmatmul.mubr.f32.vlgmr.msra.gmra.mxu1 %v350_v36 }
 0x222   : > { %1280 = vmatprep.mubr.msk.f32.mxu1 %vm804_vm12, %v353_v38 }
 0x225   : > { %882 = vmatmul.mubr.f32.gmra.mxu1 %v352_v39 }
 0x226   : > { %v802_v5 = vpop.permute.xlu1 %801 }
 0x228   : > { %v797_v1 = vpop.permute.xlu0 %796 }
 0x2e1   : > { %v877_v40 = vpop.f32.mrf.mxu1 }
 0x2e2   : > { %v878_v41 = vadd.f32 %v877_v40, %v797_v1 }
 0x2e3   : > { %v879_v14 = vpop.f32.mrf.mxu1 }
 0x2e4   : > { %v1812_v11 = vmax.f32 %v878_v41, 0.0  ;;  %v880_v24 = vadd.f32 %v879_v14, %v797_v1 }
 0x2e5   : > { %v883_v3 = vpop.f32.mrf.mxu1 }
 0x2e6   : > { %v1814_v27 = vmax.f32 %v880_v24, 0.0  ;;  %988 = vrot.lane.b32.xlu1 %v1812_v11, %s1331_s18  ;;  %v884_v43 = vadd.f32 %v883_v3, %v802_v5 }
 0x2e7   : > { %v885_v42 = vpop.f32.mrf.mxu1 }
 0x2e8   : > { %992 = vrot.lane.b32.xlu0 %v1814_v27, %s1331_s18  ;;  %v886_v44 = vadd.f32 %v885_v42, %v802_v5  ;;  %v1838_v45 = vmax.f32 %v884_v43, 0.0 }
 0x2ea   : > { %972 = vrot.lane.b32.xlu1 %v1812_v11, %s1328_s15  ;;  %v1842_v48 = vmax.f32 %v886_v44, 0.0 }
 0x2ec   : > { %976 = vrot.lane.b32.xlu0 %v1814_v27, %s1328_s15 }
 0x2ee   : > { %956 = vrot.lane.b32.xlu1 %v1812_v11, %s1329_s16 }
 0x2f0   : > { %960 = vrot.lane.b32.xlu0 %v1814_v27, %s1329_s16 }
 0x2f2   : > { %940 = vrot.lane.b32.xlu1 %v1812_v11, %s1336_s22 }
 0x2f4   : > { %944 = vrot.lane.b32.xlu0 %v1814_v27, %s1336_s22 }
 0x2f6   : > { %924 = vrot.lane.b32.xlu1 %v1812_v11, %s1332_s19 }
 0x2f8   : > { %928 = vrot.lane.b32.xlu0 %v1814_v27, %s1332_s19 }
 0x2fa   : > { %908 = vrot.lane.b32.xlu1 %v1812_v11, %s1330_s17 }
 0x2fc   : > { %912 = vrot.lane.b32.xlu0 %v1814_v27, %s1330_s17 }
 0x2fe   : > { %990 = vrot.lane.b32.xlu1 %v1838_v45, %s1331_s18 }
 0x300   : > { %994 = vrot.lane.b32.xlu0 %v1842_v48, %s1331_s18 }
 0x302   : > { %974 = vrot.lane.b32.xlu1 %v1838_v45, %s1328_s15 }
 0x304   : > { %978 = vrot.lane.b32.xlu0 %v1842_v48, %s1328_s15 }
 0x306   : > { %958 = vrot.lane.b32.xlu1 %v1838_v45, %s1329_s16 }
 0x308   : > { %962 = vrot.lane.b32.xlu0 %v1842_v48, %s1329_s16 }
 0x30a   : > { %892 = vrot.lane.b32.xlu1 %v1812_v11, %s1335_s21 }
 0x30c   : > { %896 = vrot.lane.b32.xlu0 %v1814_v27, %s1335_s21 }
 0x30e   : > { %942 = vrot.lane.b32.xlu1 %v1838_v45, %s1336_s22 }
 0x310   : > { %946 = vrot.lane.b32.xlu0 %v1842_v48, %s1336_s22 }
 0x312   : > { %926 = vrot.lane.b32.xlu1 %v1838_v45, %s1332_s19 }
 0x314   : > { %930 = vrot.lane.b32.xlu0 %v1842_v48, %s1332_s19 }
 0x316   : > { %910 = vrot.lane.b32.xlu1 %v1838_v45, %s1330_s17 }
 0x318   : > { %914 = vrot.lane.b32.xlu0 %v1842_v48, %s1330_s17 }
 0x31a   : > { %894 = vrot.lane.b32.xlu1 %v1838_v45, %s1335_s21 }
 0x31c   : > { %898 = vrot.lane.b32.xlu0 %v1842_v48, %s1335_s21  ;;  %s1221_s21 = scalar_lea.vmem %s2037_s8, %s1286_s11 }
 0x31e   : > { %1006 = vrot.lane.b32.xlu1 %v1838_v45, %s1333_s20 }
 0x320   : > { %1010 = vrot.lane.b32.xlu0 %v1842_v48, %s1333_s20 }
 0x322   : > { %1004 = vrot.lane.b32.xlu1 %v1812_v11, %s1333_s20 }
 0x324   : > { %1008 = vrot.lane.b32.xlu0 %v1814_v27, %s1333_s20 }
 0x326   : > { %1022 = vperm.xlu1 %1310, %v359_v30  }
 0x358   : > { %v989_v50 = vpop.permute.xlu1 %988 }
 0x35a   : > { %v993_v54 = vpop.permute.xlu0 %992 }
 0x35b   : > { %v998_v6 = vsel %vm481_vm2, %v993_v54, %v989_v50  ;;  %v996_v9 = vsel %vm481_vm2, %v989_v50, %v993_v54 }
 0x35c   : > { %v973_v55 = vpop.permute.xlu1 %972  ;;  %v1001_v16 = vmul.f32 %v998_v6, %v1494_v31  ;;  %v1000_v18 = vmul.f32 %v996_v9, %v1502_v35 }
 0x35e   : > { %v977_v56 = vpop.permute.xlu0 %976 }
 0x35f   : > { %v982_v20 = vsel %vm464_vm1, %v977_v56, %v973_v55  ;;  %v980_v36 = vsel %vm464_vm1, %v973_v55, %v977_v56 }
 0x360   : > { %v957_v57 = vpop.permute.xlu1 %956  ;;  %v984_v40 = vmul.f32 %v980_v36, %v1484_v25 }
 0x362   : > { %v961_v58 = vpop.permute.xlu0 %960 }
 0x363   : > { %v966_v41 = vsel %vm447_vm0, %v961_v58, %v957_v57  ;;  %v964_v3 = vsel %vm447_vm0, %v957_v57, %v961_v58 }
 0x364   : > { %v941_v59 = vpop.permute.xlu1 %940  ;;  %v968_v44 = vmul.f32 %v964_v3, %v1476_v22 }
 0x366   : > { %v945_v61 = vpop.permute.xlu0 %944 }
 0x367   : > { %v948_v50 = vsel %vm430_vm10, %v941_v59, %v945_v61 }
 0x368   : > { %v1895_v62 = vpop.permute.xlu1 %924  ;;  %v953_v57 = vmul.f32 %v948_v50, %v1581_v28 }
 0x36a   : > { %v1897_v32 = vpop.permute.xlu0 %928 }
 0x36c   : > { %v1899_v34 = vpop.permute.xlu1 %908 }
 0x36e   : > { %v1901_v63 = vpop.permute.xlu0 %912 }
 0x370   : > { %v991_v4 = vpop.permute.xlu1 %990 }
 0x372   : > { %v995_v2 = vpop.permute.xlu0 %994 }
 0x373   : > { %v997_v7 = vsel %vm481_vm2, %v991_v4, %v995_v2  ;;  %v999_v8 = vsel %vm481_vm2, %v995_v2, %v991_v4 }
 0x374   : > { %v1002_v15 = vmul.f32 %v997_v7, %v1502_v35  ;;  %v1003_v13 = vmul.f32 %v999_v8, %v1494_v31  ;;  %v975_v0 = vpop.permute.xlu1 %974  ;;  %v985_v35 = vmul.f32 %v982_v20, %v1487_v26  ;;  %v916_v8 = vsel %vm396_vm3, %v1899_v34, %v1901_v63 }
 0x376   : > { %v979_v17 = vpop.permute.xlu0 %978  ;;  %1029 = vmatprep.subr.mxu0 %v1003_v13  ;;  %v921_v13 = vmul.f32 %v916_v8, %v1507_v37 }
 0x377   : > { %v981_v21 = vsel %vm464_vm1, %v975_v0, %v979_v17  ;;  %v983_v23 = vsel %vm464_vm1, %v979_v17, %v975_v0  ;;  %1030 = vmatpush1.msra.mxu0 %v1002_v15 }
 0x378   : > { %v986_v38 = vmul.f32 %v981_v21, %v1484_v25  ;;  %v987_v31 = vmul.f32 %v983_v23, %v1487_v26  ;;  %1031 = vmatprep.subr.mxu0 %v1001_v16  ;;  %v959_v39 = vpop.permute.xlu1 %958  ;;  %v969_v25 = vmul.f32 %v966_v41, %v1470_v19 }
 0x379   : > { %1032 = vmatpush1.msra.mxu0 %v1000_v18 }
 0x37a   : > { %v963_v1 = vpop.permute.xlu0 %962  ;;  %1033 = vmatprep.subr.mxu0 %v987_v31 }
 0x37b   : > { %v965_v14 = vsel %vm447_vm0, %v959_v39, %v963_v1  ;;  %v967_v24 = vsel %vm447_vm0, %v963_v1, %v959_v39  ;;  %1034 = vmatpush1.msra.mxu0 %v986_v38 }
 0x37c   : > { %v970_v5 = vmul.f32 %v965_v14, %v1476_v22  ;;  %v971_v26 = vmul.f32 %v967_v24, %v1470_v19  ;;  %1035 = vmatprep.subr.mxu0 %v985_v35  ;;  %v893_v42 = vpop.permute.xlu1 %892  ;;  %v950_v22 = vsel %vm430_vm10, %v945_v61, %v941_v59 }
 0x37d   : > { %1036 = vmatpush1.msra.mxu0 %v984_v40  ;;  %v952_v4 = vmul.f32 %v950_v22, %v1561_v10 }
 0x37e   : > { %v897_v43 = vpop.permute.xlu0 %896  ;;  %1037 = vmatprep.subr.mxu0 %v971_v26 }
 0x37f   : > { %1038 = vmatpush1.msra.mxu0 %v970_v5  ;;  %v900_v17 = vsel %vm379_vm9, %v893_v42, %v897_v43 }
 0x380   : > { %1039 = vmatprep.subr.mxu0 %v969_v25  ;;  %v943_v29 = vpop.permute.xlu1 %942 }
 0x381   : > { %1040 = vmatpush1.msra.mxu0 %v968_v44 }
 0x382   : > { %v947_v30 = vpop.permute.xlu0 %946  ;;  %1041 = vmatprep.subr.mxu0 %v1842_v48 }
 0x383   : > { %v949_v54 = vsel %vm430_vm10, %v943_v29, %v947_v30  ;;  %v951_v19 = vsel %vm430_vm10, %v947_v30, %v943_v29  ;;  %1042 = vmatpush1.msra.mxu0 %v1838_v45  ;;  %v932_v45 = vsel %vm413_vm5, %v1895_v62, %v1897_v32 }
 0x384   : > { %v954_v55 = vmul.f32 %v951_v19, %v1561_v10  ;;  %v955_v56 = vmul.f32 %v949_v54, %v1581_v28  ;;  %1043 = vmatprep.subr.mxu0 %v1814_v27  ;;  %v927_v48 = vpop.permute.xlu1 %926  ;;  %v934_v28 = vsel %vm413_vm5, %v1897_v32, %v1895_v62  ;;  %v937_v2 = vmul.f32 %v932_v45, %v1521_v47 }
 0x385   : > { %1044 = vmatpush1.msra.mxu0 %v1812_v11  ;;  %v936_v7 = vmul.f32 %v934_v28, %v1518_v46 }
 0x386   : > { %v931_v58 = vpop.permute.xlu0 %930  ;;  %1045 = vmatprep.subr.mxu0 %v955_v56 }
 0x387   : > { %v933_v59 = vsel %vm413_vm5, %v927_v48, %v931_v58  ;;  %v935_v27 = vsel %vm413_vm5, %v931_v58, %v927_v48  ;;  %1046 = vmatpush1.msra.mxu0 %v954_v55 }
 0x388   : > { %v938_v11 = vmul.f32 %v935_v27, %v1518_v46  ;;  %v939_v10 = vmul.f32 %v933_v59, %v1521_v47  ;;  %1047 = vmatprep.subr.mxu0 %v953_v57  ;;  %v911_v61 = vpop.permute.xlu1 %910  ;;  %v918_v47 = vsel %vm396_vm3, %v1901_v63, %v1899_v34  ;;  %v902_v63 = vsel %vm379_vm9, %v897_v43, %v893_v42 }
 0x389   : > { %1048 = vmatpush1.msra.mxu0 %v952_v4  ;;  %v920_v16 = vmul.f32 %v918_v47, %v1498_v33  ;;  %v904_v36 = vmul.f32 %v902_v63, %v1538_v53 }
 0x38a   : > { %v915_v6 = vpop.permute.xlu0 %914  ;;  %1049 = vmatprep.subr.mxu0 %v939_v10 }
 0x38b   : > { %v917_v62 = vsel %vm396_vm3, %v911_v61, %v915_v6  ;;  %v919_v32 = vsel %vm396_vm3, %v915_v6, %v911_v61  ;;  %1050 = vmatpush1.msra.mxu0 %v938_v11  ;;  %v1282_v61 = vld.sshfl [vmem:[%s1404_s14 + $0x4] sm:$0x33 pattern:$0x76325410] }
 0x38c   : > { %v922_v9 = vmul.f32 %v919_v32, %v1498_v33  ;;  %v923_v46 = vmul.f32 %v917_v62, %v1507_v37  ;;  %1051 = vmatprep.subr.mxu0 %v937_v2  ;;  %v895_v15 = vpop.permute.xlu1 %894  ;;  %v905_v33 = vmul.f32 %v900_v17, %v1546_v60  ;;  %v1133_v2 = vcombine.high %v1282_v61, %v1282_v61 }
 0x38d   : > { %1052 = vmatpush1.msra.mxu0 %v936_v7 }
 0x38e   : > { %v899_v0 = vpop.permute.xlu0 %898  ;;  %1053 = vmatprep.subr.mxu0 %v923_v46 }
 0x38f   : > { %v901_v18 = vsel %vm379_vm9, %v895_v15, %v899_v0  ;;  %v903_v34 = vsel %vm379_vm9, %v899_v0, %v895_v15  ;;  %1054 = vmatpush1.msra.mxu0 %v922_v9 }
 0x390   : > { %v906_v20 = vmul.f32 %v903_v34, %v1538_v53  ;;  %v907_v37 = vmul.f32 %v901_v18, %v1546_v60  ;;  %1055 = vmatprep.subr.mxu0 %v921_v13  ;;  %v1007_v21 = vpop.permute.xlu1 %1006 }
 0x391   : > { %1056 = vmatpush1.msra.mxu0 %v920_v16 }
 0x392   : > { %v1011_v23 = vpop.permute.xlu0 %1010  ;;  %1057 = vmatprep.subr.mxu0 %v907_v37 }
 0x393   : > { %v1013_v38 = vsel %vm498_vm7, %v1007_v21, %v1011_v23  ;;  %v1015_v31 = vsel %vm498_vm7, %v1011_v23, %v1007_v21  ;;  %1058 = vmatpush1.msra.mxu0 %v906_v20 }
 0x394   : > { %v1018_v39 = vmul.f32 %v1529_v51, %v1013_v38  ;;  %v1019_v35 = vmul.f32 %v1534_v52, %v1015_v31  ;;  %1059 = vmatprep.subr.mxu0 %v905_v33  ;;  %v1005_v1 = vpop.permute.xlu1 %1004 }
 0x395   : > { %1060 = vmatpush1.msra.mxu0 %v904_v36 }
 0x396   : > { %v1009_v40 = vpop.permute.xlu0 %1008  ;;  %1089 = vmatprep.subr.mxu0 %v1019_v35 }
 0x397   : > { %v1012_v60 = vsel %vm498_vm7, %v1005_v1, %v1009_v40  ;;  %v1014_v53 = vsel %vm498_vm7, %v1009_v40, %v1005_v1  ;;  %1090 = vmatpush2.msra.mxu0 %v1018_v39 }
 0x398   : > { %v1016_v41 = vmul.f32 %v1529_v51, %v1012_v60  ;;  %v1017_v14 = vmul.f32 %v1534_v52, %v1014_v53 }
 0x39a   : > { %1091 = vmatprep.subr.mxu0 %v1017_v14 }
 0x39b   : > { %1092 = vmatpush2.msra.mxu0 %v1016_v41 }
 0x39c   : > { %1094 = vmatmul.mubr.f32.vlgmr.msra.gmra.mxu0 %v1875_v49 }
 0x3a1   : > { %v1023_v24 = vpop.permute.xlu1 %1022 }
 0x45c   : > { %v1095_v3 = vpop.f32.mrf.mxu0 }
 0x45d   : > { %v1096_v5 = vadd.f32 %v1095_v3, %v1023_v24 }
 0x45e   : > { %v1097_v26 = vpop.f32.mrf.mxu0 }
 0x45f   : > { %1312 = vtanh.f32 %v1096_v5  ;;  %v1098_v42 = vadd.f32 %v1097_v26, %v1023_v24 }
 0x461   : > { %1314 = vtanh.f32 %v1098_v42 }
 0x46c   : > { %v1313_v25 = vpop.eup %1312 }
 0x46d   : > { %v1102_v12 = vsel %vm547_vm4, %v1313_v25, 0.0  ;;  %v1140_v32 = vrot.slane %v1313_v25, 2 }
 0x46e   : > { %v1315_v43 = vpop.eup %1314  ;;  %v1103_v44 = vrot.slane %v1102_v12, 4 }
 0x46f   : > { %v1109_v51 = vsel %vm547_vm4, %v1315_v43, 0.0  ;;  %v1141_v47 = vrot.slane %v1315_v43, 2 }
 0x470   : > { %v1104_v29 = vadd.f32 %v1103_v44, %v1102_v12  ;;  %v1110_v52 = vrot.slane %v1109_v51, 4 }
 0x472   : > { %v1105_v30 = vrot.slane %v1104_v29, 2  ;;  %v1111_v50 = vadd.f32 %v1110_v52, %v1109_v51 }
 0x474   : > { %v1106_v54 = vadd.f32 %v1105_v30, %v1104_v29  ;;  %v1112_v49 = vrot.slane %v1111_v50, 2 }
 0x476   : > { %v1107_v19 = vrot.slane %v1106_v54, 1  ;;  %v1113_v22 = vadd.f32 %v1112_v49, %v1111_v50 }
 0x478   : > { %v1108_v55 = vadd.f32 %v1107_v19, %v1106_v54  ;;  %v1114_v56 = vrot.slane %v1113_v22, 1 }
 0x47a   : > { %v1115_v48 = vadd.f32 %v1114_v56, %v1113_v22  ;;  %v1117_v57 = vmul.f32 0.5, %v1108_v55 }
 0x47c   : > { %v1118_v58 = vmul.f32 0.5, %v1115_v48  ;;  %v1119_v4 = vsub.f32 %v1313_v25, %v1117_v57 }
 0x47e   : > { %v1120_v45 = vsub.f32 %v1315_v43, %v1118_v58  ;;  %v1121_v59 = vmul.f32 1.442695, %v1119_v4  ;;  %v1158_v28 = vsel %vm547_vm4, %v1119_v4, 0.0 }
 0x480   : > { %v1123_v27 = vmul.f32 1.442695, %v1120_v45  ;;  %v1159_v11 = vsel %vm547_vm4, %v1120_v45, 0.0  ;;  %1316 = vpow2.f32 %v1121_v59 }
 0x481   : > { %v1160_v10 = vadd.f32 %v1159_v11, %v1158_v28 }
 0x482   : > { %1318 = vpow2.f32 %v1123_v27 }
 0x483   : > { %1161 = vadd.xlane.f32.xlu0 %v1160_v10 }
 0x48d   : > { %v1317_v6 = vpop.eup %1316 }
 0x48e   : > { %v1136_v7 = vmul.f32 %v1317_v6, %v1282_v61 }
 0x48f   : > { %v1319_v8 = vpop.eup %1318 }
 0x490   : > { %v1137_v62 = vmul.f32 %v1319_v8, %v1133_v2  ;;  %v1144_v46 = vadd.f32 %v1140_v32, %v1136_v7 }
 0x492   : > { %v1145_v9 = vadd.f32 %v1141_v47, %v1137_v62 }
 0x494   : > { %v1148_v15 = vcombine.low %v1144_v46, %v1145_v9 }
 0x496   : > { %1288 = vst.sshfl [vmem:[%s1221_s21 + $0x4] sm:$0x33 pattern:$0x76325410] %v1148_v15 }
 0x50c   : > { %v1162_v13 = vpop.xlane.xlu0 %1161 }
 0x50d   : > { %v1163_v0 = vrot.slane %v1162_v13, 4 }
 0x50f   : > { %v1164_v16 = vadd.f32 %v1163_v0, %v1162_v13 }
 0x511   : > { %v1165_v17 = vrot.slane %v1164_v16, 2 }
 0x513   : > { %v1166_v18 = vadd.f32 %v1165_v17, %v1164_v16 }
 0x515   : > { %v1167_v34 = vrot.slane %v1166_v18, 1 }
 0x517   : > { %v1168_v63 = vadd.f32 %v1167_v34, %v1166_v18 }
 0x519   : > { %1289 = vpush %v1168_v63 }
 0x54a   : > { %s1290_s25 = spop %1289 }
 0x54b   : > { %v1170_v20 = vstv %s1290_s25 }
 0x54c   : > { %1172 = vst.msk [vmem:[%s343_s24] sm:$0x1] %vm1171_vm13, %v1170_v20 }
 0x54d PF: > { %s20_s30 = sadd.s32 1, %s1326_s30  }
 0x54e   : > { %p17_p4 = scmp.ge.s32.totalorder %s20_s30, 4  }
 0x550   :  { %19 = sbr.rel (!%p17_p4) target bundleno = 1 (0x1), region = 94 }

</bundles_post_ra>
